<compile_context>
chip_gen: v5e
topology: v5e:2x2
jax: 0.10.0
libtpu: 0.0.40
codegen_flags: <defaults>
</compile_context>

<pallas_src>
import jax
import jax.numpy as jnp
from jax.experimental import pallas as pl
from jax.experimental.pallas import tpu as pltpu


def make_decoder_kernel(B):
    def kernel(p_ref, w1_ref, m_ref, w2_ref, b2_ref, out_ref):
        # ---- conv1 (+bias folded) + ReLU: (C1, K1+1) @ (K1+1, B*HW) ----
        a1 = jnp.maximum(
            jnp.dot(w1_ref[...], p_ref[...],
                    preferred_element_type=jnp.float32), 0.0)        # (C1, B*HW)

        # ---- per-batch, per-tap window sums on the MXU ----
        # s[b*9+t, k] = sum_p mask[b*9+t, b*HW+p] * a1[k, b*HW+p]
        s = jax.lax.dot_general(m_ref[...], a1,
                                (((1,), (1,)), ((), ())),
                                preferred_element_type=jnp.float32)  # (B*9, C1)

        # ---- flatten (t, k) onto lanes per batch row: (B, 9*C1), t-major ----
        # tiny (18 x 64) data; static row slices + lane concat
        s_flat = jnp.concatenate(
            [jnp.concatenate([s[b * 9 + t:b * 9 + t + 1, :] for t in range(9)],
                             axis=1)
             for b in range(B)], axis=0)                             # (B, 9*C1)

        # ---- conv2 fused with global average pool (w2 pre-scaled by 1/HW) ----
        pooled = jax.lax.dot_general(s_flat, w2_ref[...],
                                     (((1,), (1,)), ((), ())),
                                     preferred_element_type=jnp.float32)  # (B, C2)
        out_ref[...] = pooled + b2_ref[...]

    return kernel


def watermark_decoder(x_nhwc, w1, b1, w2, b2):
    """x_nhwc: (B, H, W, 3) f32; w1: (9, 3, 64); b1: (1, 64);
    w2: (9, 64, 4); b2: (1, 4). Returns (B, 4) f32."""
    B, H, W, C_in = x_nhwc.shape
    C1 = w1.shape[-1]
    C2 = w2.shape[-1]
    HW = H * W
    K1 = 9 * C_in

    # --- im2col, transposed so positions sit on the lane axis ---
    x_pad = jnp.pad(x_nhwc, ((0, 0), (1, 1), (1, 1), (0, 0)))
    taps = jnp.stack([x_pad[:, dy:dy + H, dx:dx + W, :]
                      for dy in range(3) for dx in range(3)], axis=0)   # (9,B,H,W,Cin)
    patches = taps.transpose(0, 4, 1, 2, 3).reshape(K1, B * HW)         # (27, B*HW)
    patches = jnp.concatenate(
        [patches, jnp.ones((1, B * HW), jnp.float32)], axis=0)          # (28, B*HW)

    # conv1 weights with the bias folded in as the extra column
    w1aug = jnp.concatenate([w1.reshape(K1, C1).T,
                             b1.reshape(C1, 1)], axis=1)                # (C1, 28)

    # --- constant block-diagonal tap-window mask (depends only on shapes) ---
    # window for tap (dy, dx): y in [max(0,dy-1), min(H-1,H-2+dy)], same for x
    yy = jnp.arange(H)
    xx = jnp.arange(W)
    dd = jnp.arange(3)[:, None]
    vy = ((yy[None, :] >= dd - 1) & (yy[None, :] <= H - 2 + dd)).astype(jnp.float32)
    vx = ((xx[None, :] >= dd - 1) & (xx[None, :] <= W - 2 + dd)).astype(jnp.float32)
    m_tp = (vy[:, None, :, None] * vx[None, :, None, :]).reshape(9, HW)  # (9, HW)
    m_big = jnp.kron(jnp.eye(B, dtype=jnp.float32), m_tp)                # (B*9, B*HW)

    # conv2 weights lane-dense (C2, 9*C1), pre-scaled by 1/HW (mean pooling)
    w2c = w2.transpose(2, 0, 1).reshape(C2, 9 * C1) * (1.0 / float(HW))  # (4, 576)
    b2r = b2.reshape(1, C2)

    vmem = lambda: pl.BlockSpec(memory_space=pltpu.MemorySpace.VMEM)
    out = pl.pallas_call(
        make_decoder_kernel(B),
        out_shape=jax.ShapeDtypeStruct((B, C2), jnp.float32),
        in_specs=[vmem() for _ in range(5)],
        out_specs=vmem(),
    )(patches, w1aug, m_big, w2c, b2r)
    return out


def reference_decoder(x_nhwc, w1, b1, w2, b2):
    """Pure-JAX reference (lax conv, full f32 precision) for correctness."""
    C_in, C1 = w1.shape[1], w1.shape[2]
    C2 = w2.shape[2]
    w1_hwio = w1.reshape(3, 3, C_in, C1)
    w2_hwio = w2.reshape(3, 3, C1, C2)
    dn1 = jax.lax.conv_dimension_numbers(x_nhwc.shape, w1_hwio.shape,
                                         ('NHWC', 'HWIO', 'NHWC'))
    a = jax.lax.conv_general_dilated(x_nhwc, w1_hwio, (1, 1), 'SAME',
                                     dimension_numbers=dn1,
                                     precision=jax.lax.Precision.HIGHEST) + b1[0]
    a = jnp.maximum(a, 0.0)
    dn2 = jax.lax.conv_dimension_numbers(a.shape, w2_hwio.shape,
                                         ('NHWC', 'HWIO', 'NHWC'))
    y = jax.lax.conv_general_dilated(a, w2_hwio, (1, 1), 'SAME',
                                     dimension_numbers=dn2,
                                     precision=jax.lax.Precision.HIGHEST) + b2[0]
    return jnp.mean(y, axis=(1, 2))  # (B, 4)


if __name__ == "__main__":
    key = jax.random.PRNGKey(0)
    k_x, k_w1, k_b1, k_w2, k_b2 = jax.random.split(key, 5)

    B, H, W = 2, 16, 16
    C_in, C1, C2 = 3, 64, 4

    # Deterministic synthetic parameters (shapes match nn.Conv2d in __init__),
    # stored as (kh*kw, C_in, C_out).
    w1 = jax.random.normal(k_w1, (9, C_in, C1), jnp.float32) * 0.1
    b1 = jax.random.normal(k_b1, (1, C1), jnp.float32) * 0.1
    w2 = jax.random.normal(k_w2, (9, C1, C2), jnp.float32) * 0.1
    b2 = jax.random.normal(k_b2, (1, C2), jnp.float32) * 0.1

    # Input image in NHWC (PyTorch would pass NCHW (2, 3, 16, 16)).
    x = jax.random.normal(k_x, (B, H, W, C_in), jnp.float32)

    decoder = jax.jit(watermark_decoder)
    out = jax.block_until_ready(decoder(x, w1, b1, w2, b2))

    ref = reference_decoder(x, w1, b1, w2, b2)
    assert out.shape == (B, C2), out.shape
    assert jnp.allclose(out, ref, rtol=1e-3, atol=1e-4), (out, ref)

    print("KERNEL_OK")
</pallas_src>

<mosaic_0001>
module attributes {stable_mosaic.version = 11 : i64} {
  func.func @kernel(%arg0: memref<28x512xf32, #tpu.memory_space<vmem>>, %arg1: memref<64x28xf32, #tpu.memory_space<vmem>>, %arg2: memref<18x512xf32, #tpu.memory_space<vmem>>, %arg3: memref<4x576xf32, #tpu.memory_space<vmem>>, %arg4: memref<1x4xf32, #tpu.memory_space<vmem>>, %arg5: memref<2x4xf32, #tpu.memory_space<vmem>>) attributes {dimension_semantics = [], scalar_prefetch = 0 : i64, scratch_operands = 0 : i64, tpu.core_type = #tpu.core_type<tc>} {
    %c0 = arith.constant 0 : index
    %c0_0 = arith.constant 0 : index
    %0 = vector.load %arg1[%c0, %c0_0] : memref<64x28xf32, #tpu.memory_space<vmem>>, vector<64x28xf32>
    %c0_1 = arith.constant 0 : index
    %c0_2 = arith.constant 0 : index
    %1 = vector.load %arg0[%c0_1, %c0_2] : memref<28x512xf32, #tpu.memory_space<vmem>>, vector<28x512xf32>
    %cst = arith.constant dense<0.000000e+00> : vector<64x512xf32>
    %2 = tpu.matmul %0, %1, %cst {dimension_numbers = #tpu.dot_dimension_numbers<[1], [0], [0], [1], [0, 0, 1, 1], [], []>} : vector<64x28xf32>, vector<28x512xf32>, vector<64x512xf32> -> vector<64x512xf32>
    %cst_3 = arith.constant 0.000000e+00 : f32
    %3 = vector.broadcast %cst_3 : f32 to vector<64x512xf32>
    %4 = arith.maximumf %2, %3 : vector<64x512xf32>
    %c0_4 = arith.constant 0 : index
    %c0_5 = arith.constant 0 : index
    %5 = vector.load %arg2[%c0_4, %c0_5] : memref<18x512xf32, #tpu.memory_space<vmem>>, vector<18x512xf32>
    %cst_6 = arith.constant dense<0.000000e+00> : vector<18x64xf32>
    %6 = tpu.matmul %5, %4, %cst_6 {dimension_numbers = #tpu.dot_dimension_numbers<[1], [1], [0], [0], [0, 0, 1, 0], [], []>} : vector<18x512xf32>, vector<64x512xf32>, vector<18x64xf32> -> vector<18x64xf32>
    %7 = vector.extract_strided_slice %6 {offsets = [0, 0], sizes = [1, 64], strides = [1, 1]} : vector<18x64xf32> to vector<1x64xf32>
    %8 = vector.extract_strided_slice %6 {offsets = [1, 0], sizes = [1, 64], strides = [1, 1]} : vector<18x64xf32> to vector<1x64xf32>
    %9 = vector.extract_strided_slice %6 {offsets = [2, 0], sizes = [1, 64], strides = [1, 1]} : vector<18x64xf32> to vector<1x64xf32>
    %10 = vector.extract_strided_slice %6 {offsets = [3, 0], sizes = [1, 64], strides = [1, 1]} : vector<18x64xf32> to vector<1x64xf32>
    %11 = vector.extract_strided_slice %6 {offsets = [4, 0], sizes = [1, 64], strides = [1, 1]} : vector<18x64xf32> to vector<1x64xf32>
    %12 = vector.extract_strided_slice %6 {offsets = [5, 0], sizes = [1, 64], strides = [1, 1]} : vector<18x64xf32> to vector<1x64xf32>
    %13 = vector.extract_strided_slice %6 {offsets = [6, 0], sizes = [1, 64], strides = [1, 1]} : vector<18x64xf32> to vector<1x64xf32>
    %14 = vector.extract_strided_slice %6 {offsets = [7, 0], sizes = [1, 64], strides = [1, 1]} : vector<18x64xf32> to vector<1x64xf32>
    %15 = vector.extract_strided_slice %6 {offsets = [8, 0], sizes = [1, 64], strides = [1, 1]} : vector<18x64xf32> to vector<1x64xf32>
    %16 = tpu.concatenate %7, %8, %9, %10, %11, %12, %13, %14, %15 in 1 : vector<1x64xf32>, vector<1x64xf32>, vector<1x64xf32>, vector<1x64xf32>, vector<1x64xf32>, vector<1x64xf32>, vector<1x64xf32>, vector<1x64xf32>, vector<1x64xf32> -> vector<1x576xf32>
    %17 = vector.extract_strided_slice %6 {offsets = [9, 0], sizes = [1, 64], strides = [1, 1]} : vector<18x64xf32> to vector<1x64xf32>
    %18 = vector.extract_strided_slice %6 {offsets = [10, 0], sizes = [1, 64], strides = [1, 1]} : vector<18x64xf32> to vector<1x64xf32>
    %19 = vector.extract_strided_slice %6 {offsets = [11, 0], sizes = [1, 64], strides = [1, 1]} : vector<18x64xf32> to vector<1x64xf32>
    %20 = vector.extract_strided_slice %6 {offsets = [12, 0], sizes = [1, 64], strides = [1, 1]} : vector<18x64xf32> to vector<1x64xf32>
    %21 = vector.extract_strided_slice %6 {offsets = [13, 0], sizes = [1, 64], strides = [1, 1]} : vector<18x64xf32> to vector<1x64xf32>
    %22 = vector.extract_strided_slice %6 {offsets = [14, 0], sizes = [1, 64], strides = [1, 1]} : vector<18x64xf32> to vector<1x64xf32>
    %23 = vector.extract_strided_slice %6 {offsets = [15, 0], sizes = [1, 64], strides = [1, 1]} : vector<18x64xf32> to vector<1x64xf32>
    %24 = vector.extract_strided_slice %6 {offsets = [16, 0], sizes = [1, 64], strides = [1, 1]} : vector<18x64xf32> to vector<1x64xf32>
    %25 = vector.extract_strided_slice %6 {offsets = [17, 0], sizes = [1, 64], strides = [1, 1]} : vector<18x64xf32> to vector<1x64xf32>
    %26 = tpu.concatenate %17, %18, %19, %20, %21, %22, %23, %24, %25 in 1 : vector<1x64xf32>, vector<1x64xf32>, vector<1x64xf32>, vector<1x64xf32>, vector<1x64xf32>, vector<1x64xf32>, vector<1x64xf32>, vector<1x64xf32>, vector<1x64xf32> -> vector<1x576xf32>
    %27 = tpu.concatenate %16, %26 in 0 : vector<1x576xf32>, vector<1x576xf32> -> vector<2x576xf32>
    %c0_7 = arith.constant 0 : index
    %c0_8 = arith.constant 0 : index
    %28 = vector.load %arg3[%c0_7, %c0_8] : memref<4x576xf32, #tpu.memory_space<vmem>>, vector<4x576xf32>
    %cst_9 = arith.constant dense<0.000000e+00> : vector<2x4xf32>
    %29 = tpu.matmul %27, %28, %cst_9 {dimension_numbers = #tpu.dot_dimension_numbers<[1], [1], [0], [0], [0, 0, 1, 0], [], []>} : vector<2x576xf32>, vector<4x576xf32>, vector<2x4xf32> -> vector<2x4xf32>
    %c0_10 = arith.constant 0 : index
    %c0_11 = arith.constant 0 : index
    %30 = vector.load %arg4[%c0_10, %c0_11] : memref<1x4xf32, #tpu.memory_space<vmem>>, vector<1x4xf32>
    %31 = vector.broadcast %30 : vector<1x4xf32> to vector<2x4xf32>
    %32 = arith.addf %29, %31 : vector<2x4xf32>
    %c0_12 = arith.constant 0 : index
    %c0_13 = arith.constant 0 : index
    %33 = vector.load %arg5[%c0_12, %c0_13] : memref<2x4xf32, #tpu.memory_space<vmem>>, vector<2x4xf32>
    tpu.vector_store %arg5[%c0_12, %c0_13], %32 {strides = array<i32>} : memref<2x4xf32, #tpu.memory_space<vmem>>, vector<2x4xf32>,
    return
  }
}

</mosaic_0001>

<bundles_post_ra>
// kernel: watermark_decoder.1
= control target key start
LH: loop header
LB: loop body
LE: loop exit
PB: predicated region body
PF: predicated region fallthrough
CT: control target
= control target key end

     0   :  { %vm70_vm0 = vcmask 1043456   ;;  %vm45_vm1 = vcmask 228352   ;;  %s947_s0 = inlined_call_operand.vmem [shape: f32[28,512], index: 0, kind: input, shape index: {}]   ;;  %s948_s1 = inlined_call_operand.vmem [shape: f32[64,28], index: 1, kind: input, shape index: {}]   ;;  %s949_s2 = inlined_call_operand.vmem [shape: f32[18,512], index: 2, kind: input, shape index: {}]   ;;  %s950_s3 = inlined_call_operand.vmem [shape: f32[4,576], index: 3, kind: input, shape index: {}]   ;;  %s951_s4 = inlined_call_operand.vmem [shape: f32[1,4], index: 4, kind: input, shape index: {}]   ;;  %s952_s5 = inlined_call_operand.hbm [shape: f32[2,4], index: 5, kind: output, shape index: {}]  }
   0x1   :  { %v41_v0 = vld [vmem:[%s947_s0 + $0x60] sm:$0xf]  ;;  %v42_v1 = vld [vmem:[%s947_s0 + $0x68] sm:$0xf]  ;;  %v43_v3 = vld [vmem:[%s947_s0 + $0x70] sm:$0xf] }
   0x2   :  { %v37_v2 = vld [vmem:[%s947_s0 + $0x40] sm:$0xff]  ;;  %604 = vmatpush.msk.msra.mxu0 %vm70_vm0, %v41_v0  ;;  %613 = vmatpush.msk.msra.mxu1 %vm70_vm0, %v42_v1  ;;  %v44_v4 = vld [vmem:[%s947_s0 + $0x78] sm:$0xf]  ;;  %v38_v5 = vld [vmem:[%s947_s0 + $0x48] sm:$0xff] }
   0x3   :  { %622 = vmatpush.msk.msra.mxu2 %vm70_vm0, %v43_v3  ;;  %631 = vmatpush.msk.msra.mxu3 %vm70_vm0, %v44_v4  ;;  %v39_v6 = vld [vmem:[%s947_s0 + $0x50] sm:$0xff]  ;;  %v40_v7 = vld [vmem:[%s947_s0 + $0x58] sm:$0xff]  ;;  %v33_v8 = vld [vmem:[%s947_s0 + $0x20] sm:$0xff] }
   0x4   :  { %96 = vmatpush.msra.mxu0 %v37_v2  ;;  %137 = vmatpush.msra.mxu1 %v38_v5  ;;  %v34_v9 = vld [vmem:[%s947_s0 + $0x28] sm:$0xff]  ;;  %v35_v10 = vld [vmem:[%s947_s0 + $0x30] sm:$0xff]  ;;  %v36_v11 = vld [vmem:[%s947_s0 + $0x38] sm:$0xff] }
   0x5   :  { %178 = vmatpush.msra.mxu2 %v39_v6  ;;  %219 = vmatpush.msra.mxu3 %v40_v7  ;;  %v29_v12 = vld [vmem:[%s947_s0] sm:$0xff]  ;;  %v30_v13 = vld [vmem:[%s947_s0 + $0x8] sm:$0xff]  ;;  %v31_v14 = vld [vmem:[%s947_s0 + $0x10] sm:$0xff] }
   0x6   :  { %97 = vmatpush.msra.mxu0 %v33_v8  ;;  %138 = vmatpush.msra.mxu1 %v34_v9  ;;  %v32_v15 = vld [vmem:[%s947_s0 + $0x18] sm:$0xff]  ;;  %v21_v16 = vld [vmem:[%s948_s1] sm:$0xff] }
   0x7   :  { %179 = vmatpush.msra.mxu2 %v35_v10  ;;  %220 = vmatpush.msra.mxu3 %v36_v11 }
   0x8   :  { %98 = vmatpush.msra.mxu0 %v29_v12  ;;  %139 = vmatpush.msra.mxu1 %v30_v13 }
   0x9   :  { %10 = vsyncpa [#allocation3], 0  ;;  %180 = vmatpush.msra.mxu2 %v31_v14  ;;  %221 = vmatpush.msra.mxu3 %v32_v15  ;;  %v22_v17 = vld [vmem:[%s948_s1 + $0x8] sm:$0xff]  ;;  %v23_v18 = vld [vmem:[%s948_s1 + $0x10] sm:$0xff]  ;;  %vm418_vm2 = vcmask 523264   ;;  %vm451_vm3 = vcmask 1040384  }
   0xa   :  { %605 = vmatmul.msk.f32.vlgmr.msra.gmra.mxu0 %vm45_vm1, %v21_v16  ;;  %614 = vmatmul.msk.f32.vlgmr.msra.gmra.mxu1 %vm45_vm1, %v21_v16  ;;  %v24_v19 = vld [vmem:[%s948_s1 + $0x18] sm:$0xff]  ;;  %v25_v20 = vld [vmem:[%s948_s1 + $0x20] sm:$0xff]  ;;  %v26_v21 = vld [vmem:[%s948_s1 + $0x28] sm:$0xff]  ;;  %s692_s18 = smov [#allocation2]   ;;  %s595_s22 = sshll.u32 %s952_s5, 4  ;;  %vm586_vm4 = vcmask 25600   ;;  %s596_s22 = int_to_ptr.hbm [resolvable:$true] %s595_s22 }
   0xb   :  { %623 = vmatmul.msk.f32.vlgmr.msra.gmra.mxu2 %vm45_vm1, %v21_v16  ;;  %632 = vmatmul.msk.f32.vlgmr.msra.gmra.mxu3 %vm45_vm1, %v21_v16  ;;  %v27_v22 = vld [vmem:[%s948_s1 + $0x30] sm:$0xff]  ;;  %v28_v23 = vld [vmem:[%s948_s1 + $0x38] sm:$0xff]  ;;  %s593_s19 = sshll.u32 %s692_s18, 4  ;;  %s594_s19 = int_to_ptr.vmem [resolvable:$true] %s593_s19 }
  0x12   :  { %606 = vmatmul.msk.f32.gmra.mxu0 %vm45_vm1, %v22_v17  ;;  %615 = vmatmul.msk.f32.gmra.mxu1 %vm45_vm1, %v22_v17 }
  0x13   :  { %624 = vmatmul.msk.f32.gmra.mxu2 %vm45_vm1, %v22_v17  ;;  %633 = vmatmul.msk.f32.gmra.mxu3 %vm45_vm1, %v22_v17 }
  0x1a   :  { %607 = vmatmul.msk.f32.gmra.mxu0 %vm45_vm1, %v23_v18  ;;  %616 = vmatmul.msk.f32.gmra.mxu1 %vm45_vm1, %v23_v18 }
  0x1b   :  { %625 = vmatmul.msk.f32.gmra.mxu2 %vm45_vm1, %v23_v18  ;;  %634 = vmatmul.msk.f32.gmra.mxu3 %vm45_vm1, %v23_v18 }
  0x22   :  { %608 = vmatmul.msk.f32.gmra.mxu0 %vm45_vm1, %v24_v19  ;;  %617 = vmatmul.msk.f32.gmra.mxu1 %vm45_vm1, %v24_v19 }
  0x23   :  { %626 = vmatmul.msk.f32.gmra.mxu2 %vm45_vm1, %v24_v19  ;;  %635 = vmatmul.msk.f32.gmra.mxu3 %vm45_vm1, %v24_v19 }
  0x2a   :  { %609 = vmatmul.msk.f32.gmra.mxu0 %vm45_vm1, %v25_v20  ;;  %618 = vmatmul.msk.f32.gmra.mxu1 %vm45_vm1, %v25_v20 }
  0x2b   :  { %627 = vmatmul.msk.f32.gmra.mxu2 %vm45_vm1, %v25_v20  ;;  %636 = vmatmul.msk.f32.gmra.mxu3 %vm45_vm1, %v25_v20 }
  0x32   :  { %610 = vmatmul.msk.f32.gmra.mxu0 %vm45_vm1, %v26_v21  ;;  %619 = vmatmul.msk.f32.gmra.mxu1 %vm45_vm1, %v26_v21 }
  0x33   :  { %628 = vmatmul.msk.f32.gmra.mxu2 %vm45_vm1, %v26_v21  ;;  %637 = vmatmul.msk.f32.gmra.mxu3 %vm45_vm1, %v26_v21 }
  0x3a   :  { %611 = vmatmul.msk.f32.gmra.mxu0 %vm45_vm1, %v27_v22  ;;  %620 = vmatmul.msk.f32.gmra.mxu1 %vm45_vm1, %v27_v22 }
  0x3b   :  { %629 = vmatmul.msk.f32.gmra.mxu2 %vm45_vm1, %v27_v22  ;;  %638 = vmatmul.msk.f32.gmra.mxu3 %vm45_vm1, %v27_v22  ;;  %v279_v22 = vld [vmem:[%s949_s2] sm:$0xff] }
  0x42   :  { %612 = vmatmul.msk.f32.gmra.mxu0 %vm45_vm1, %v28_v23  ;;  %621 = vmatmul.msk.f32.gmra.mxu1 %vm45_vm1, %v28_v23 }
  0x43   :  { %630 = vmatmul.msk.f32.gmra.mxu2 %vm45_vm1, %v28_v23  ;;  %639 = vmatmul.msk.f32.gmra.mxu3 %vm45_vm1, %v28_v23  ;;  %v280_v23 = vld [vmem:[%s949_s2 + $0x8] sm:$0xff] }
  0x87   :  { %v827_v24 = vpop.f32.mrf.mxu0  ;;  %v829_v25 = vpop.f32.mrf.mxu1 }
  0x88   :  { %v247_v18 = vmax.f32 %v827_v24, 0.0  ;;  %v248_v19 = vmax.f32 %v829_v25, 0.0 }
  0x8e   :  { %v831_v26 = vpop.f32.mrf.mxu2  ;;  %v833_v27 = vpop.f32.mrf.mxu3 }
  0x8f   :  { %v835_v28 = vpop.f32.mrf.mxu0  ;;  %v837_v29 = vpop.f32.mrf.mxu1  ;;  %v249_v24 = vmax.f32 %v831_v26, 0.0  ;;  %v250_v25 = vmax.f32 %v833_v27, 0.0  ;;  %v284_v26 = vld [vmem:[%s949_s2 + $0x28] sm:$0xff]  ;;  %v285_v27 = vld [vmem:[%s949_s2 + $0x30] sm:$0xff] }
  0x90   :  { %v251_v14 = vmax.f32 %v835_v28, 0.0  ;;  %v252_v15 = vmax.f32 %v837_v29, 0.0  ;;  %v281_v28 = vld [vmem:[%s949_s2 + $0x10] sm:$0xff]  ;;  %v282_v29 = vld [vmem:[%s949_s2 + $0x18] sm:$0xff] }
  0x96   :  { %v839_v30 = vpop.f32.mrf.mxu2  ;;  %v841_v31 = vpop.f32.mrf.mxu3 }
  0x97   :  { %v106_v32 = vpop.f32.mrf.mxu0  ;;  %v147_v33 = vpop.f32.mrf.mxu1  ;;  %v253_v20 = vmax.f32 %v839_v30, 0.0  ;;  %v254_v21 = vmax.f32 %v841_v31, 0.0  ;;  %v283_v30 = vld [vmem:[%s949_s2 + $0x20] sm:$0xff]  ;;  %v286_v31 = vld [vmem:[%s949_s2 + $0x38] sm:$0xff] }
  0x98   :  { %v255_v10 = vmax.f32 %v106_v32, 0.0  ;;  %v256_v11 = vmax.f32 %v147_v33, 0.0  ;;  %v287_v32 = vld [vmem:[%s949_s2 + $0x40] sm:$0x3]  ;;  %v288_v33 = vld [vmem:[%s949_s2 + $0x48] sm:$0x3] }
  0x9e   :  { %v843_v34 = vpop.f32.mrf.mxu2  ;;  %v845_v35 = vpop.f32.mrf.mxu3 }
  0x9f   :  { %v109_v36 = vpop.f32.mrf.mxu0  ;;  %v150_v37 = vpop.f32.mrf.mxu1  ;;  %v257_v16 = vmax.f32 %v843_v34, 0.0  ;;  %v258_v17 = vmax.f32 %v845_v35, 0.0  ;;  %v289_v34 = vld [vmem:[%s949_s2 + $0x50] sm:$0x3]  ;;  %v290_v35 = vld [vmem:[%s949_s2 + $0x58] sm:$0x3] }
  0xa0   :  { %v259_v6 = vmax.f32 %v109_v36, 0.0  ;;  %v260_v7 = vmax.f32 %v150_v37, 0.0  ;;  %s691_s2 = smov 64  }
  0xa6   :  { %v191_v38 = vpop.f32.mrf.mxu2  ;;  %v232_v39 = vpop.f32.mrf.mxu3 }
  0xa7   :  { %v112_v40 = vpop.f32.mrf.mxu0  ;;  %v153_v41 = vpop.f32.mrf.mxu1  ;;  %v261_v12 = vmax.f32 %v191_v38, 0.0  ;;  %v262_v13 = vmax.f32 %v232_v39, 0.0 }
  0xa8   :  { %v263_v2 = vmax.f32 %v112_v40, 0.0  ;;  %v264_v3 = vmax.f32 %v153_v41, 0.0 }
  0xae   :  { %v194_v42 = vpop.f32.mrf.mxu2  ;;  %v235_v43 = vpop.f32.mrf.mxu3 }
  0xaf   :  { %v115_v44 = vpop.f32.mrf.mxu0  ;;  %v156_v45 = vpop.f32.mrf.mxu1  ;;  %v265_v8 = vmax.f32 %v194_v42, 0.0  ;;  %v266_v9 = vmax.f32 %v235_v43, 0.0 }
  0xb0   :  { %v267_v62 = vmax.f32 %v115_v44, 0.0  ;;  %v268_v63 = vmax.f32 %v156_v45, 0.0 }
  0xb6   :  { %v197_v46 = vpop.f32.mrf.mxu2  ;;  %v238_v47 = vpop.f32.mrf.mxu3 }
  0xb7   :  { %v118_v48 = vpop.f32.mrf.mxu0  ;;  %v159_v49 = vpop.f32.mrf.mxu1  ;;  %v269_v4 = vmax.f32 %v197_v46, 0.0  ;;  %v270_v5 = vmax.f32 %v238_v47, 0.0 }
  0xb8   :  { %v271_v56 = vmax.f32 %v118_v48, 0.0  ;;  %v272_v57 = vmax.f32 %v159_v49, 0.0 }
  0xbe   :  { %v200_v50 = vpop.f32.mrf.mxu2  ;;  %v241_v51 = vpop.f32.mrf.mxu3 }
  0xbf   :  { %v121_v52 = vpop.f32.mrf.mxu0  ;;  %v162_v53 = vpop.f32.mrf.mxu1  ;;  %v273_v0 = vmax.f32 %v200_v50, 0.0  ;;  %v274_v1 = vmax.f32 %v241_v51, 0.0 }
  0xc0   :  { %v275_v54 = vmax.f32 %v121_v52, 0.0  ;;  %v276_v55 = vmax.f32 %v162_v53, 0.0 }
  0xc2   :  { %299 = vmatpush.xpose.msrb.mxu0 %v275_v54  ;;  %325 = vmatpush.xpose.msrb.mxu1 %v276_v55 }
  0xc6   :  { %v203_v58 = vpop.f32.mrf.mxu2  ;;  %v244_v59 = vpop.f32.mrf.mxu3  ;;  %300 = vmatpush.xpose.msrb.mxu0 %v271_v56  ;;  %326 = vmatpush.xpose.msrb.mxu1 %v272_v57 }
  0xc7   :  { %v277_v60 = vmax.f32 %v203_v58, 0.0  ;;  %v278_v61 = vmax.f32 %v244_v59, 0.0 }
  0xc9   :  { %351 = vmatpush.xpose.msrb.mxu2 %v277_v60  ;;  %377 = vmatpush.xpose.msrb.mxu3 %v278_v61 }
  0xca   :  { %301 = vmatpush.xpose.msrb.mxu0 %v267_v62  ;;  %327 = vmatpush.xpose.msrb.mxu1 %v268_v63 }
  0xcd   :  { %352 = vmatpush.xpose.msrb.mxu2 %v273_v0  ;;  %378 = vmatpush.xpose.msrb.mxu3 %v274_v1 }
  0xce   :  { %302 = vmatpush.xpose.msrb.mxu0 %v263_v2  ;;  %328 = vmatpush.xpose.msrb.mxu1 %v264_v3 }
  0xd1   :  { %353 = vmatpush.xpose.msrb.mxu2 %v269_v4  ;;  %379 = vmatpush.xpose.msrb.mxu3 %v270_v5  ;;  %v458_v5 = vld [vmem:[%s950_s3 + $0x8] sm:$0xff] }
  0xd2   :  { %303 = vmatpush.xpose.msrb.mxu0 %v259_v6  ;;  %329 = vmatpush.xpose.msrb.mxu1 %v260_v7  ;;  %469 = vst [vmem:[#allocation1 + $0x10] ss:$2 sm:$0xff] %v458_v5  ;;  %v457_v7 = vld [vmem:[%s950_s3] sm:$0xff] }
  0xd3   :  { %467 = vst [vmem:[#allocation1] ss:$2 sm:$0xff] %v457_v7 }
  0xd5   :  { %354 = vmatpush.xpose.msrb.mxu2 %v265_v8  ;;  %380 = vmatpush.xpose.msrb.mxu3 %v266_v9 }
  0xd6   :  { %304 = vmatpush.xpose.msrb.mxu0 %v255_v10  ;;  %330 = vmatpush.xpose.msrb.mxu1 %v256_v11  ;;  %v459_v10 = vld [vmem:[%s950_s3 + $0x10] sm:$0xf] }
  0xd7   :  { %471 = vst [vmem:[#allocation1 + $0x20] ss:$2 sm:$0xff] %v459_v10 }
  0xd9   :  { %355 = vmatpush.xpose.msrb.mxu2 %v261_v12  ;;  %381 = vmatpush.xpose.msrb.mxu3 %v262_v13  ;;  %v474_v6 = vld.sshfl [vmem:[#allocation1 + $0x10] sm:$0xff pattern:$0x75316420]  ;;  %v475_v9 = vld.sshfl [vmem:[#allocation1 + $0x18] sm:$0xff pattern:$0x75316420] }
  0xda   :  { %305 = vmatpush.xpose.msrb.mxu0 %v251_v14  ;;  %331 = vmatpush.xpose.msrb.mxu1 %v252_v15  ;;  %v472_v8 = vld.sshfl [vmem:[#allocation1] sm:$0xff pattern:$0x75316420]  ;;  %v473_v11 = vld.sshfl [vmem:[#allocation1 + $0x8] sm:$0xff pattern:$0x75316420] }
  0xdd   :  { %356 = vmatpush.xpose.msrb.mxu2 %v257_v16  ;;  %382 = vmatpush.xpose.msrb.mxu3 %v258_v17 }
  0xde   :  { %306 = vmatpush.xpose.msrb.mxu0 %v247_v18  ;;  %332 = vmatpush.xpose.msrb.mxu1 %v248_v19  ;;  %v476_v12 = vld.sshfl [vmem:[#allocation1 + $0x20] sm:$0xff pattern:$0x75316420] }
  0xe1   :  { %357 = vmatpush.xpose.msrb.mxu2 %v253_v20  ;;  %383 = vmatpush.xpose.msrb.mxu3 %v254_v21 }
  0xe2   :  { %307 = vmatmul.f32.vlgmr.msrb.gmra.mxu0 %v279_v22  ;;  %333 = vmatmul.f32.vlgmr.msrb.gmra.mxu1 %v280_v23 }
  0xe3   :  { %501 = vmatpush.xpose.msra.mxu0 %v472_v8  ;;  %521 = vmatpush.xpose.msra.mxu1 %v473_v11 }
  0xe5   :  { %358 = vmatpush.xpose.msrb.mxu2 %v249_v24  ;;  %384 = vmatpush.xpose.msrb.mxu3 %v250_v25 }
  0xe7   :  { %640 = vmatpush.xpose.msk.msrb.mxu0 %vm418_vm2, %v476_v12 }
  0xe8   :  { %359 = vmatmul.f32.vlgmr.msrb.gmra.mxu2 %v281_v28  ;;  %385 = vmatmul.f32.vlgmr.msrb.gmra.mxu3 %v282_v29 }
  0xe9   :  { %541 = vmatpush.xpose.msra.mxu2 %v474_v6  ;;  %561 = vmatpush.xpose.msra.mxu3 %v475_v9 }
  0xea   :  { %310 = vmatmul.f32.gmra.mxu0 %v283_v30  ;;  %336 = vmatmul.f32.gmra.mxu1 %v284_v26 }
  0xf0   :  { %362 = vmatmul.f32.gmra.mxu2 %v285_v27  ;;  %388 = vmatmul.f32.gmra.mxu3 %v286_v31 }
  0xf2   :  { %313 = vmatmul.f32.gmra.mxu0 %v287_v32  ;;  %339 = vmatmul.f32.gmra.mxu1 %v288_v33 }
  0xf8   :  { %365 = vmatmul.f32.gmra.mxu2 %v289_v34  ;;  %391 = vmatmul.f32.gmra.mxu3 %v290_v35 }
 0x15f   :  { %v308_v36 = vpop.f32.mrf.mxu0  ;;  %v334_v37 = vpop.f32.mrf.mxu1 }
 0x160   :  { %v335_v42 = vadd.f32 %v334_v37, %v308_v36 }
 0x167   :  { %v311_v38 = vpop.f32.mrf.mxu0  ;;  %v337_v39 = vpop.f32.mrf.mxu1 }
 0x168   :  { %v338_v44 = vadd.f32 %v337_v39, %v311_v38 }
 0x16b   :  { %v360_v40 = vpop.f32.mrf.mxu2  ;;  %v386_v41 = vpop.f32.mrf.mxu3 }
 0x16c   :  { %v361_v43 = vadd.f32 %v360_v40, %v335_v42 }
 0x16e   :  { %v893_v47 = vadd.f32 %v386_v41, %v361_v43 }
 0x16f   :  { %v314_v49 = vpop.f32.mrf.mxu0  ;;  %v340_v50 = vpop.f32.mrf.mxu1 }
 0x170   :  { %v341_v52 = vadd.f32 %v340_v50, %v314_v49  ;;  %v408_v53 = vrot.slane %v893_v47, 5  ;;  %v396_v60 = vrot.slane %v893_v47, 1  ;;  %v414_v61 = vrot.slane %v893_v47, 7 }
 0x171   :  { %v402_v3 = vrot.slane %v893_v47, 3  ;;  %v406_v16 = vrot.slane %v893_v47, 4  ;;  %v412_v21 = vrot.slane %v893_v47, 6  ;;  %v400_v36 = vrot.slane %v893_v47, 2 }
 0x172   :  { %v649_v0 = vpack.i.bf16 %v414_v61, %v396_v60 }
 0x173   :  { %v363_v45 = vpop.f32.mrf.mxu2  ;;  %v389_v46 = vpop.f32.mrf.mxu3 }
 0x174   :  { %v364_v48 = vadd.f32 %v363_v45, %v338_v44  ;;  %v664_v44 = vld [vmem:[%s951_s4] ss:$0 sm:$0xff] }
 0x176   :  { %v895_v51 = vadd.f32 %v389_v46, %v364_v48 }
 0x178   :  { %v436_v54 = vrot.slane %v895_v51, 5  ;;  %v424_v63 = vrot.slane %v895_v51, 1  ;;  %v430_v2 = vrot.slane %v895_v51, 3  ;;  %v434_v17 = vrot.slane %v895_v51, 4 }
 0x179   :  { %v440_v24 = vrot.slane %v895_v51, 6  ;;  %v428_v37 = vrot.slane %v895_v51, 2 }
 0x17a   :  { %v644_v55 = vpack.i.bf16 %v436_v54, %v408_v53  ;;  %v659_v4 = vpack.i.bf16 %v430_v2, %v402_v3 }
 0x17b   :  { %v366_v56 = vpop.f32.mrf.mxu2  ;;  %v392_v57 = vpop.f32.mrf.mxu3 }
 0x17c   :  { %v367_v58 = vadd.f32 %v366_v56, %v341_v52  ;;  %645 = vrot.lane.b32.xlu0 %v644_v55, %s691_s2 }
 0x17e   :  { %v899_v59 = vadd.f32 %v392_v57, %v367_v58 }
 0x180   :  { %v443_v62 = vrot.slane %v899_v59, 7  ;;  %v456_v42 = vsel %vm451_vm3, %v895_v51, %v899_v59 }
 0x182   :  { %v654_v1 = vpack.i.bf16 %v443_v62, %v424_v63 }
 0x184   :  { %650 = vrot.lane.b32.xlu0 %v649_v0, %s691_s2  ;;  %655 = vrot.lane.b32.xlu1 %v654_v1, %s691_s2 }
 0x18c   :  { %660 = vrot.lane.b32.xlu1 %v659_v4, %s691_s2 }
 0x1ee   :  { %v646_v13 = vpop.permute.xlu0 %645 }
 0x1ef   :  { %v648_v14 = vunpack.i.h.bf16 %v646_v13  ;;  %v647_v15 = vunpack.i.l.bf16 %v646_v13 }
 0x1f1   :  { %v421_v18 = vsel %vm418_vm2, %v406_v16, %v647_v15  ;;  %v449_v19 = vsel %vm418_vm2, %v434_v17, %v648_v14 }
 0x1f2   :  { %v454_v20 = vsel %vm451_vm3, %v421_v18, %v449_v19 }
 0x1f3   :  { %542 = vmatmul.f32.vlgmr.msra.gmra.mxu2 %v454_v20 }
 0x1f6   :  { %v651_v22 = vpop.permute.xlu0 %650  ;;  %v656_v23 = vpop.permute.xlu1 %655 }
 0x1f7   :  { %v653_v25 = vunpack.i.h.bf16 %v651_v22  ;;  %v652_v28 = vunpack.i.l.bf16 %v651_v22  ;;  %v658_v29 = vunpack.i.h.bf16 %v656_v23  ;;  %v657_v30 = vunpack.i.l.bf16 %v656_v23 }
 0x1f9   :  { %v422_v26 = vsel %vm418_vm2, %v412_v21, %v653_v25  ;;  %v419_v27 = vsel %vm418_vm2, %v893_v47, %v652_v28  ;;  %v447_v31 = vsel %vm418_vm2, %v895_v51, %v657_v30  ;;  %v450_v32 = vsel %vm418_vm2, %v440_v24, %v658_v29 }
 0x1fa   :  { %v452_v33 = vsel %vm451_vm3, %v419_v27, %v447_v31  ;;  %v455_v34 = vsel %vm451_vm3, %v422_v26, %v450_v32 }
 0x1fb   :  { %502 = vmatmul.f32.vlgmr.msra.gmra.mxu0 %v452_v33  ;;  %562 = vmatmul.f32.vlgmr.msra.gmra.mxu3 %v455_v34 }
 0x1fe   :  { %v661_v35 = vpop.permute.xlu1 %660 }
 0x1ff   :  { %v663_v38 = vunpack.i.h.bf16 %v661_v35  ;;  %v662_v39 = vunpack.i.l.bf16 %v661_v35 }
 0x201   :  { %v448_v40 = vsel %vm418_vm2, %v428_v37, %v663_v38  ;;  %v420_v41 = vsel %vm418_vm2, %v400_v36, %v662_v39 }
 0x202   :  { %v453_v43 = vsel %vm451_vm3, %v420_v41, %v448_v40 }
 0x203   :  { %522 = vmatmul.f32.vlgmr.msra.gmra.mxu1 %v453_v43  ;;  %641 = vmatmul.msk.f32.vlgmr.msrb.gmra.mxu0 %vm418_vm2, %v456_v42 }
 0x276   :  { %v543_v49 = vpop.f32.mrf.mxu2 }
 0x278   :  { %v503_v45 = vpop.f32.mrf.mxu0 }
 0x279   :  { %v504_v46 = vadd.f32 %v664_v44, %v503_v45 }
 0x27e   :  { %v563_v52 = vpop.f32.mrf.mxu3 }
 0x280   :  { %v523_v47 = vpop.f32.mrf.mxu1  ;;  %v583_v53 = vpop.f32.mrf.mxu0 }
 0x281   :  { %v524_v48 = vadd.f32 %v523_v47, %v504_v46 }
 0x283   :  { %v544_v50 = vadd.f32 %v543_v49, %v524_v48 }
 0x285   :  { %v564_v51 = vadd.f32 %v563_v52, %v544_v50 }
 0x287   :  { %v584_v54 = vadd.f32 %v583_v53, %v564_v51 }
 0x289   :  { %587 = vst.msk [vmem:[#allocation2] sm:$0x3] %vm586_vm4, %v584_v54 }
 0x28a   :  { %598 = dma.vmem_to_hbm [thread:$0]  %s594_s19, 32, %s596_s22, [#allocation3]  }
 0x28b   :  { %689 = dma.done.wait [#allocation3], 32  }
 0x28c   :  { %690 = vsyncadd [#allocation3], 4294967264 }
 0x28d   :  { %603 = vsyncpa [#allocation3], 1 }

</bundles_post_ra>
